<compile_context>
chip_gen: v7x
topology: tpu7x:2x2x1
jax: 0.10.0
libtpu: 0.0.40
codegen_flags: <defaults>
</compile_context>

<pallas_src>
import math
from functools import partial

import jax
import jax.numpy as jnp
from jax.experimental import pallas as pl
from jax.experimental.pallas import tpu as pltpu


LANE = 512             # lane-dense last dim (multiple of 128)
MAX_BLOCK_ROWS = 512   # 512 x 512 f32 = 1 MiB per stream per pipeline buffer
TARGET_GRID_STEPS = 4  # enough steps for pipelining + v7x megacore sharding
VMEM_LIMIT_BYTES = 40 << 20  # well above the 14 MiB pipeline footprint, safe on v5e


def _round_up(x, m):
    return ((x + m - 1) // m) * m


def _plan_layout(total_elems):
    """Pick (padded_rows, block_rows) for the fused flat (rows, LANE) buffer.

    Goals (in priority order): >= 2 grid steps (ideally TARGET_GRID_STEPS) so the
    software pipeline overlaps DMA with compute and v7x megacore can shard the
    "parallel" axis; minimal zero-pad waste; block as large as possible (<= 1 MiB
    per stream) to amortize the ~0.35 us per-grid-step overhead.
    """
    rows = max(_round_up(-(-total_elems // LANE), 8), 8)
    if rows <= 8:
        return rows, rows  # one tiny 16 KiB tile: nothing to pipeline

    ideal = min(MAX_BLOCK_ROWS,
                max(8, _round_up(-(-rows // TARGET_GRID_STEPS), 8)))
    lo = max(8, _round_up(ideal // 2, 8))

    best_key, best_b, best_padded = None, rows, rows
    for b in range(lo, ideal + 1, 8):
        padded = _round_up(rows, b)
        steps = padded // b
        if steps < 2:
            continue
        # minimize padding; prefer an even step count (v7x 2-core split); then
        # prefer the larger block.
        key = (padded - rows, steps % 2, -b)
        if best_key is None or key < best_key:
            best_key, best_b, best_padded = key, b, padded
    return best_padded, best_b


def _pack_flat(arrays, rows):
    """Concatenate + zero-pad arrays into a (rows, LANE) f32 slab (trace-safe)."""
    flat = jnp.concatenate([jnp.ravel(a).astype(jnp.float32) for a in arrays])
    pad = rows * LANE - flat.shape[0]
    if pad:
        flat = jnp.pad(flat, (0, pad))
    return flat.reshape(rows, LANE)


def _adam_kernel(scalars_ref, p_ref, g_ref, m_ref, v_ref, p_out, m_out, v_out):
    # Runtime hyper-parameters live in SMEM -> one compile for all step counts.
    beta1 = scalars_ref[0]
    one_minus_beta1 = scalars_ref[1]
    beta2 = scalars_ref[2]
    one_minus_beta2 = scalars_ref[3]
    alpha = scalars_ref[4]          # lr / (1 - beta1**t)
    inv_sqrt_bc2 = scalars_ref[5]   # 1 / sqrt(1 - beta2**t)
    eps = scalars_ref[6]

    g = g_ref[...]
    m_new = beta1 * m_ref[...] + one_minus_beta1 * g
    v_new = beta2 * v_ref[...] + one_minus_beta2 * (g * g)

    # p -= lr/bc1 * m_new / (sqrt(v_new)/sqrt(bc2) + eps)  (PyTorch Adam form).
    # Zero-padded tail rows stay zero: m_new == 0 there, so the update is 0.
    denom = jnp.sqrt(v_new) * inv_sqrt_bc2 + eps
    p_out[...] = p_ref[...] - (alpha * m_new) * pl.reciprocal(denom, approx=True)
    m_out[...] = m_new
    v_out[...] = v_new


@partial(jax.jit,
         static_argnames=("block_rows", "lr", "beta1", "beta2", "eps"),
         donate_argnums=(0, 2, 3))
def _adam_step_packed(p, grads, m, v, t, *, block_rows, lr, beta1, beta2, eps):
    """One fused Adam step.  `grads` is a pytree of per-parameter gradients; the
    packing into the fused (rows, LANE) layout happens inside this jit so XLA
    fuses it instead of running extra eager HBM passes."""
    rows, lanes = p.shape
    g = _pack_flat(jax.tree_util.tree_leaves(grads), rows)

    tf = jnp.asarray(t, jnp.float32)
    bc1 = 1.0 - beta1 ** tf
    bc2 = 1.0 - beta2 ** tf
    scalars = jnp.stack([
        jnp.full((), beta1, jnp.float32),
        jnp.full((), 1.0 - beta1, jnp.float32),
        jnp.full((), beta2, jnp.float32),
        jnp.full((), 1.0 - beta2, jnp.float32),
        (lr / bc1).astype(jnp.float32),
        jax.lax.rsqrt(bc2).astype(jnp.float32),
        jnp.full((), eps, jnp.float32),
    ])

    block = pl.BlockSpec((block_rows, lanes), lambda i: (i, 0))
    smem_spec = pl.BlockSpec(memory_space=pltpu.MemorySpace.SMEM)
    out_sds = jax.ShapeDtypeStruct((rows, lanes), jnp.float32)

    n = rows * lanes
    cost = pl.CostEstimate(flops=10 * n,
                           transcendentals=2 * n,
                           bytes_accessed=28 * n)  # read p,g,m,v + write p,m,v

    return pl.pallas_call(
        _adam_kernel,
        out_shape=(out_sds, out_sds, out_sds),
        grid=(rows // block_rows,),
        in_specs=[smem_spec, block, block, block, block],
        out_specs=(block, block, block),
        input_output_aliases={1: 0, 3: 1, 4: 2},   # p->p_out, m->m_out, v->v_out
        compiler_params=pltpu.CompilerParams(
            dimension_semantics=("parallel",),
            vmem_limit_bytes=VMEM_LIMIT_BYTES),
        cost_estimate=cost,
    )(scalars, p, g, m, v)


class BanknoteOptimizerPallas:
    """JAX/Pallas analogue of the PyTorch BanknoteOptimizer module."""

    def __init__(self, parameters, lr=0.001, beta1=0.9, beta2=0.999, eps=1e-8):
        params = [jnp.asarray(p, jnp.float32) for p in parameters()]
        self._shapes = [p.shape for p in params]
        self._sizes = [int(math.prod(s)) for s in self._shapes]
        total = sum(self._sizes)
        self._rows, self._block_rows = _plan_layout(total)

        self.lr = float(lr)
        self.beta1 = float(beta1)
        self.beta2 = float(beta2)
        self.eps = float(eps)

        # Fused flat state (one buffer each for params / m / v). One-time pack.
        self._p = _pack_flat(params, self._rows)
        self._m = jnp.zeros_like(self._p)
        self._v = jnp.zeros_like(self._p)
        self.t = 0

    # --- lazy unpack: only touches HBM when parameters are actually consumed ---
    def _unpack(self, buf):
        flat = buf.reshape(-1)
        outs, off = [], 0
        for shp, sz in zip(self._shapes, self._sizes):
            outs.append(flat[off:off + sz].reshape(shp))
            off += sz
        return outs

    @property
    def params(self):
        return self._unpack(self._p)

    @property
    def packed_params(self):
        return self._p

    def step(self, grads):
        """Apply one Adam update (single fused Pallas launch).

        Returns the packed parameter buffer; call `.params` only when the
        per-tensor views are actually needed (avoids a full extra HBM pass
        per step)."""
        self.t += 1
        grads = tuple(jnp.asarray(g) for g in grads)
        self._p, self._m, self._v = _adam_step_packed(
            self._p, grads, self._m, self._v, self.t,
            block_rows=self._block_rows, lr=self.lr,
            beta1=self.beta1, beta2=self.beta2, eps=self.eps)
        return self._p

    def forward(self):
        # Faithful to the reference module: forward() is a no-op.
        pass

    def __call__(self):
        return self.forward()


def _adam_reference(p, g, m, v, lr, beta1, beta2, eps, step):
    m_new = beta1 * m + (1.0 - beta1) * g
    v_new = beta2 * v + (1.0 - beta2) * g * g
    m_hat = m_new / (1.0 - beta1 ** step)
    v_hat = v_new / (1.0 - beta2 ** step)
    return p - lr * m_hat / (jnp.sqrt(v_hat) + eps), m_new, v_new


if __name__ == "__main__":
    key = jax.random.PRNGKey(0)
    keys = jax.random.split(key, 12)

    # Small deterministic "model" parameters (MLP-ish shapes). Total 16,576 elems
    # -> 40 packed rows, block_rows=8, grid=(5,): exercises real multi-step
    # pipelining and the input_output_aliases path.
    shapes = [(64, 128), (128,), (128, 64), (64,)]
    params0 = [jax.random.normal(keys[i], s, dtype=jnp.float32)
               for i, s in enumerate(shapes)]
    grads1 = [jax.random.normal(keys[4 + i], s, dtype=jnp.float32)
              for i, s in enumerate(shapes)]
    grads2 = [jax.random.normal(keys[8 + i], s, dtype=jnp.float32)
              for i, s in enumerate(shapes)]

    opt = BanknoteOptimizerPallas(lambda: params0, lr=0.001)

    # Reference forward() semantics: no-op.
    assert opt.forward() is None

    # Two kernelized Adam steps (same compiled kernel for both step counts).
    opt.step(grads1)
    p_after_1 = opt.params          # lazy unpack, only because the test needs it
    opt.step(grads2)
    p_after_2 = opt.params
    jax.block_until_ready(p_after_2)

    # Pure-JAX Adam reference for two steps, per parameter.
    ok = True
    for idx in range(len(shapes)):
        rp = params0[idx]
        rm = jnp.zeros_like(rp)
        rv = jnp.zeros_like(rp)
        rp1, rm, rv = _adam_reference(rp, grads1[idx], rm, rv,
                                      0.001, 0.9, 0.999, 1e-8, 1)
        rp2, rm, rv = _adam_reference(rp1, grads2[idx], rm, rv,
                                      0.001, 0.9, 0.999, 1e-8, 2)
        ok &= bool(jnp.allclose(p_after_1[idx], rp1, atol=1e-5, rtol=1e-5))
        ok &= bool(jnp.allclose(p_after_2[idx], rp2, atol=1e-5, rtol=1e-5))
        ok &= bool(jnp.allclose(opt._unpack(opt._m)[idx], rm, atol=1e-6, rtol=1e-6))
        ok &= bool(jnp.allclose(opt._unpack(opt._v)[idx], rv, atol=1e-6, rtol=1e-6))
    assert ok, "Pallas Adam step does not match the pure-JAX reference"

    print("KERNEL_OK")
</pallas_src>

<mosaic_0001>
module attributes {stable_mosaic.version = 11 : i64} {
  func.func @_adam_kernel(%arg0: i32, %arg1: memref<7xf32, #tpu.memory_space<smem>>, %arg2: memref<8x512xf32, #tpu.memory_space<vmem>>, %arg3: memref<8x512xf32, #tpu.memory_space<vmem>>, %arg4: memref<8x512xf32, #tpu.memory_space<vmem>>, %arg5: memref<8x512xf32, #tpu.memory_space<vmem>>, %arg6: memref<8x512xf32, #tpu.memory_space<vmem>>, %arg7: memref<8x512xf32, #tpu.memory_space<vmem>>, %arg8: memref<8x512xf32, #tpu.memory_space<vmem>>) attributes {dimension_semantics = [#tpu.dimension_semantics<parallel>], iteration_bounds = array<i64: 5>, scalar_prefetch = 0 : i64, scratch_operands = 0 : i64, tpu.core_type = #tpu.core_type<tc>, window_params = [{transform_indices = @transform_0, window_bounds = array<i64: 7>}, {transform_indices = @transform_1, window_bounds = array<i64: 8, 512>}, {transform_indices = @transform_2, window_bounds = array<i64: 8, 512>}, {transform_indices = @transform_3, window_bounds = array<i64: 8, 512>}, {transform_indices = @transform_4, window_bounds = array<i64: 8, 512>}, {transform_indices = @transform_5, window_bounds = array<i64: 8, 512>}, {transform_indices = @transform_6, window_bounds = array<i64: 8, 512>}, {transform_indices = @transform_7, window_bounds = array<i64: 8, 512>}]} {
    %c0 = arith.constant 0 : index
    %0 = memref.load %arg1[%c0] : memref<7xf32, #tpu.memory_space<smem>>
    %c1 = arith.constant 1 : index
    %1 = memref.load %arg1[%c1] : memref<7xf32, #tpu.memory_space<smem>>
    %c2 = arith.constant 2 : index
    %2 = memref.load %arg1[%c2] : memref<7xf32, #tpu.memory_space<smem>>
    %c3 = arith.constant 3 : index
    %3 = memref.load %arg1[%c3] : memref<7xf32, #tpu.memory_space<smem>>
    %c4 = arith.constant 4 : index
    %4 = memref.load %arg1[%c4] : memref<7xf32, #tpu.memory_space<smem>>
    %c5 = arith.constant 5 : index
    %5 = memref.load %arg1[%c5] : memref<7xf32, #tpu.memory_space<smem>>
    %c6 = arith.constant 6 : index
    %6 = memref.load %arg1[%c6] : memref<7xf32, #tpu.memory_space<smem>>
    %c0_0 = arith.constant 0 : index
    %c0_1 = arith.constant 0 : index
    %7 = vector.load %arg3[%c0_0, %c0_1] : memref<8x512xf32, #tpu.memory_space<vmem>>, vector<8x512xf32>
    %c0_2 = arith.constant 0 : index
    %c0_3 = arith.constant 0 : index
    %8 = vector.load %arg4[%c0_2, %c0_3] : memref<8x512xf32, #tpu.memory_space<vmem>>, vector<8x512xf32>
    %9 = vector.broadcast %0 : f32 to vector<8x512xf32>
    %10 = arith.mulf %9, %8 : vector<8x512xf32>
    %11 = vector.broadcast %1 : f32 to vector<8x512xf32>
    %12 = arith.mulf %11, %7 : vector<8x512xf32>
    %13 = arith.addf %10, %12 : vector<8x512xf32>
    %c0_4 = arith.constant 0 : index
    %c0_5 = arith.constant 0 : index
    %14 = vector.load %arg5[%c0_4, %c0_5] : memref<8x512xf32, #tpu.memory_space<vmem>>, vector<8x512xf32>
    %15 = vector.broadcast %2 : f32 to vector<8x512xf32>
    %16 = arith.mulf %15, %14 : vector<8x512xf32>
    %17 = arith.mulf %7, %7 : vector<8x512xf32>
    %18 = vector.broadcast %3 : f32 to vector<8x512xf32>
    %19 = arith.mulf %18, %17 : vector<8x512xf32>
    %20 = arith.addf %16, %19 : vector<8x512xf32>
    %21 = math.sqrt %20 : vector<8x512xf32>
    %22 = vector.broadcast %5 : f32 to vector<8x512xf32>
    %23 = arith.mulf %21, %22 : vector<8x512xf32>
    %24 = vector.broadcast %6 : f32 to vector<8x512xf32>
    %25 = arith.addf %23, %24 : vector<8x512xf32>
    %c0_6 = arith.constant 0 : index
    %c0_7 = arith.constant 0 : index
    %26 = vector.load %arg2[%c0_6, %c0_7] : memref<8x512xf32, #tpu.memory_space<vmem>>, vector<8x512xf32>
    %27 = vector.broadcast %4 : f32 to vector<8x512xf32>
    %28 = arith.mulf %27, %13 : vector<8x512xf32>
    %29 = tpu.reciprocal %25 {approx = true} : vector<8x512xf32> -> vector<8x512xf32>
    %30 = arith.mulf %28, %29 : vector<8x512xf32>
    %31 = arith.subf %26, %30 : vector<8x512xf32>
    %c0_8 = arith.constant 0 : index
    %c0_9 = arith.constant 0 : index
    %32 = vector.load %arg6[%c0_8, %c0_9] : memref<8x512xf32, #tpu.memory_space<vmem>>, vector<8x512xf32>
    tpu.vector_store %arg6[%c0_8, %c0_9], %31 {strides = array<i32>} : memref<8x512xf32, #tpu.memory_space<vmem>>, vector<8x512xf32>,
    %c0_10 = arith.constant 0 : index
    %c0_11 = arith.constant 0 : index
    %33 = vector.load %arg7[%c0_10, %c0_11] : memref<8x512xf32, #tpu.memory_space<vmem>>, vector<8x512xf32>
    tpu.vector_store %arg7[%c0_10, %c0_11], %13 {strides = array<i32>} : memref<8x512xf32, #tpu.memory_space<vmem>>, vector<8x512xf32>,
    %c0_12 = arith.constant 0 : index
    %c0_13 = arith.constant 0 : index
    %34 = vector.load %arg8[%c0_12, %c0_13] : memref<8x512xf32, #tpu.memory_space<vmem>>, vector<8x512xf32>
    tpu.vector_store %arg8[%c0_12, %c0_13], %20 {strides = array<i32>} : memref<8x512xf32, #tpu.memory_space<vmem>>, vector<8x512xf32>,
    return
  }
  func.func @transform_0(%arg0: i32) -> i32 {
    %c0_i32 = arith.constant 0 : i32
    %c0_i32_0 = arith.constant 0 : i32
    return %c0_i32 : i32
  }
  func.func @transform_1(%arg0: i32) -> (i32, i32) {
    %c0_i32 = arith.constant 0 : i32
    %c0_i32_0 = arith.constant 0 : i32
    return %arg0, %c0_i32 : i32, i32
  }
  func.func @transform_2(%arg0: i32) -> (i32, i32) {
    %c0_i32 = arith.constant 0 : i32
    %c0_i32_0 = arith.constant 0 : i32
    return %arg0, %c0_i32 : i32, i32
  }
  func.func @transform_3(%arg0: i32) -> (i32, i32) {
    %c0_i32 = arith.constant 0 : i32
    %c0_i32_0 = arith.constant 0 : i32
    return %arg0, %c0_i32 : i32, i32
  }
  func.func @transform_4(%arg0: i32) -> (i32, i32) {
    %c0_i32 = arith.constant 0 : i32
    %c0_i32_0 = arith.constant 0 : i32
    return %arg0, %c0_i32 : i32, i32
  }
  func.func @transform_5(%arg0: i32) -> (i32, i32) {
    %c0_i32 = arith.constant 0 : i32
    %c0_i32_0 = arith.constant 0 : i32
    return %arg0, %c0_i32 : i32, i32
  }
  func.func @transform_6(%arg0: i32) -> (i32, i32) {
    %c0_i32 = arith.constant 0 : i32
    %c0_i32_0 = arith.constant 0 : i32
    return %arg0, %c0_i32 : i32, i32
  }
  func.func @transform_7(%arg0: i32) -> (i32, i32) {
    %c0_i32 = arith.constant 0 : i32
    %c0_i32_0 = arith.constant 0 : i32
    return %arg0, %c0_i32 : i32, i32
  }
}

</mosaic_0001>

<bundles_post_ra>
// kernel: _adam_step_packed.1
= control target key start
LH: loop header
LB: loop body
LE: loop exit
PB: predicated region body
PF: predicated region fallthrough
CT: control target
= control target key end

     0   :  { %s1655_s0 = inlined_call_operand.vmem [shape: f32[7], index: 0, kind: input, shape index: {}]   ;;  %s1656_s1 = inlined_call_operand.hbm [shape: f32[40,512], index: 1, kind: input, shape index: {}, may-alias: {1,5}]   ;;  %s1657_s2 = inlined_call_operand.vmem [shape: f32[40,512], index: 2, kind: input, shape index: {}]   ;;  %s1658_s3 = inlined_call_operand.hbm [shape: f32[40,512], index: 3, kind: input, shape index: {}, may-alias: {3,6}]   ;;  %s1659_s4 = inlined_call_operand.hbm [shape: f32[40,512], index: 4, kind: input, shape index: {}, may-alias: {4,7}]   ;;  %s1660_s5 = inlined_call_operand.hbm [shape: f32[40,512], index: 5, kind: output, shape index: {0}, may-alias: {1,5}]   ;;  %s1661_s6 = inlined_call_operand.hbm [shape: f32[40,512], index: 6, kind: output, shape index: {1}, may-alias: {3,6}]   ;;  %s1662_s7 = inlined_call_operand.hbm [shape: f32[40,512], index: 7, kind: output, shape index: {2}, may-alias: {4,7}]  }
   0x1   :  { %1678 = sst [smem:[#allocation24_spill]] %s1655_s0 }
   0x2   :  { %1679 = sst [smem:[#allocation25_spill]] %s1658_s3 }
   0x3   :  { %13 = vsyncpa [#allocation5], 0 }
   0x4   :  { %14 = vsyncpa [#allocation3], 0 }
   0x5   :  { %16 = vsyncpa [#allocation3 + $0x1], 0 }
   0x6   :  { %17 = vsyncpa [#allocation8], 0 }
   0x7   :  { %19 = vsyncpa [#allocation8 + $0x1], 0 }
   0x8   :  { %20 = vsyncpa [#allocation4], 0 }
   0x9   :  { %22 = vsyncpa [#allocation4 + $0x1], 0 }
   0xa   :  { %23 = vsyncpa [#allocation12], 0 }
   0xb   :  { %25 = vsyncpa [#allocation12 + $0x1], 0  ;;  %s1221_s24 = smov 0   ;;  %s1223_s25 = smov 0  }
   0xc   :  { %s1225_s26 = smov 0   ;;  %s1227_s27 = smov 0  }
   0xd LB: > { %1680 = sst [smem:[#allocation19_spill]] %s1160_s24  ;;  %s1242_s28 = sadd.s32 1, %s1172_s27   ;;  %s1172_s27 = sphi %s1227_s27, %s1708_s27   ;;  %s1168_s26 = sphi %s1225_s26, %s1710_s26   ;;  %s1164_s25 = sphi %s1223_s25, %s1712_s25   ;;  %s1160_s24 = sphi %s1221_s24, %s1711_s24  }
   0xe   : > { %1681 = sst [smem:[#allocation20_spill]] %s1168_s26  ;;  %s59_s29 = sadd.s32 1, %s1168_s26 }
   0xf   : > { %1682 = sst [smem:[#allocation21_spill]] %s1242_s28  ;;  %s56_s30 = ssub.s32 %s1172_s27, %s1242_s28 }
  0x10   : > { %p1663_p0 = scmp.ne.s32.totalorder %s1168_s26, %s1164_s25  ;;  %p57_p1 = scmp.eq.s32.totalorder %s56_s30, 0 }
  0x11   : > { %p67_p2 = scmp.eq.s32.totalorder %s1172_s27, 0  ;;  %p881_p3 = scmp.lt.s32.totalorder %s1172_s27, 5 }
  0x12   : > { %s1252_s8 = scalar_select %p57_p1, %s1168_s26, %s59_s29  }
  0x13   : > { %p68_p4 = por %p67_p2, %p1663_p0  ;;  %s1665_s9 = sand.u32 1, %s1168_s26  }
  0x14   : > { %1683 = sst [smem:[#allocation22_spill]] %s1252_s8  ;;  %s1260_s10 = sshll.u32 %s1665_s9, 5 }
  0x15   : > { %s1263_s11 = sshll.u32 %s1172_s27, 9  ;;  %p1265_p5 = pnand %p881_p3, %p68_p4 }
  0x16   : > { %s290_s13 = sand.u32 1, %s1172_s27   ;;  %s1685_s3 = sld [smem:[#allocation25_spill]] }
  0x17   : > { %s1684_s12 = scalar_select %p1265_p5, 1, 0 }
  0x18   : > { %s294_s17 = scalar_lea.vmem [#allocation7], %s1260_s10  ;;  %s1279_s19 = scalar_lea.sflag [#allocation8], %s290_s13 }
  0x19   : > { %s302_s18 = sshll.u32 %s294_s17, 4  ;;  %p1285_p7 = pneg %p1265_p5  ;;  %s1277_s18 = int_to_ptr.vmem [resolvable:$true] %s302_s18 }
  0x1c   : > { %s1274_s16 = scalar_lea.hbm %s1685_s3, %s1263_s11  ;;  %s938_s29 = scalar_lea.hbm %s1685_s3, 2560 }
  0x1d   : > { %s933_s20 = scalar_lea.hbm %s1274_s16, 512  ;;  %p939_p10 = scmp.lt.u32.totalorder %s1274_s16, %s1685_s3 }
  0x1e   : > { %p934_p6 = scmp.ne.s32.totalorder %s1274_s16, %s933_s20  ;;  %p940_p11 = scmp.lt.u32.totalorder %s938_s29, %s933_s20 }
  0x1f   : > { %p942_p13 = scmp.lt.u32.totalorder %s933_s20, %s1274_s16 }
  0x20   : > { %p936_p8 = pnand %p1285_p7, %p934_p6  ;;  %p941_p12 = por %p940_p11, %p939_p10 }
  0x22   : > { %p937_p9 = pneg %p936_p8  ;;  %p943_p1 = por %p942_p13, %p941_p12 }
  0x24   : > { %p944_p2 = pnand %p943_p1, %p937_p9 }
  0x26   : > { %947 = shalt.err (!%p944_p2)
}
  0x27   : > { %s948_s13 = scalar_lea.vmem %s1277_s18, 512  ;;  %s1174_s15 = smov [#allocation7]  }
  0x28   : > { %p949_p3 = scmp.ne.s32.totalorder %s1277_s18, %s948_s13  ;;  %s953_s17 = sshll.u32 %s1174_s15, 4  ;;  %s954_s17 = int_to_ptr.vmem [resolvable:$false] %s953_s17 }
  0x29   : > { %s955_s22 = scalar_lea.vmem %s954_s17, 1024  ;;  %p956_p8 = scmp.lt.s32.totalorder %s1277_s18, %s954_s17 }
  0x2a   : > { %p951_p4 = pnand %p949_p3, %p1285_p7  ;;  %p957_p0 = scmp.lt.s32.totalorder %s955_s22, %s948_s13 }
  0x2c   : > { %p952_p6 = pneg %p951_p4  ;;  %p958_p10 = por %p957_p0, %p956_p8 }
  0x2e   : > { %p959_p11 = pnand %p958_p10, %p952_p6 }
  0x30   : > { %962 = shalt.err (!%p959_p11)
}
  0x31   : > { %866 = dma.hbm_to_vmem [thread:$0]  (!%p1265_p5), %s1274_s16, 512, %s1277_s18, %s1279_s19  }
  0x32   : > { %s1310_s20 = sadd.s32 4294967295, %s1172_s27   ;;  %s1664_s23 = sadd.s32 4294967294, %s1172_s27  }
  0x33   : > { %p72_p0 = scmp.ne.s32.totalorder %s1164_s25, %s1160_s24  ;;  %p1670_p9 = scmp.eq.s32.totalorder %s1310_s20, 0 }
  0x34   : > { %p174_p12 = scmp.eq.s32.totalorder %s1310_s20, 4  ;;  %p180_p13 = scmp.eq.s32.totalorder %s1664_s23, 4 }
  0x35   : > { %p1321_p1 = por %p1670_p9, %p72_p0  ;;  %p794_p2 = scmp.ge.s32.totalorder %s1172_s27, 1 }
  0x36   : > { %p1688_p3 = scmp.ne.s32.totalorder %s1168_s26, %s1164_s25  ;;  %p1333_p6 = por %p180_p13, %p72_p0 }
  0x37   : > { %s1687_s29 = scalar_select %p1321_p1, 1, 0 }
  0x38   : > { %p1329_p4 = por %p174_p12, %p1688_p3  ;;  %p239_p8 = scmp.lt.s32.totalorder %s1172_s27, 6 }
  0x39   : > { %s1690_s18 = scalar_select %p1333_p6, 1, 0 }
  0x3a   : > { %s1689_s16 = scalar_select %p1329_p4, 1, 0 }
  0x3b   : > { %1691 = sst [smem:[#allocation23_spill]] %s1690_s18  ;;  %s1692_s0 = sld [smem:[#allocation24_spill]] }
  0x3c   : > { %p1341_p10 = pnand %p794_p2, %p239_p8  ;;  %s1353_s23 = scalar_lea.hbm %s1656_s1, %s1263_s11 }
  0x3d   : > { %s267_s30 = scalar_lea.vmem [#allocation6], %s1260_s10  ;;  %s963_s8 = scalar_lea.hbm %s1353_s23, 512 }
  0x3e   : > { %s1693_s15 = scalar_select %p1341_p10, 1, 0 }
  0x3f   : > { %p856_p11 = pneg %p1341_p10  ;;  %s275_s14 = sshll.u32 %s267_s30, 4  ;;  %s276_s14 = int_to_ptr.vmem [resolvable:$true] %s275_s14 }
  0x40   : > { %p964_p12 = scmp.ne.s32.totalorder %s1353_s23, %s963_s8  ;;  %s968_s28 = scalar_lea.hbm %s1656_s1, 2560 }
  0x41   : > { %s252_s13 = sshll.u32 %s1692_s0, 4  ;;  %p1358_p0 = pnand %p856_p11, %p1670_p9  ;;  %s1345_s13 = int_to_ptr.vmem [resolvable:$true] %s252_s13 }
  0x42   : > { %s1695_s0 = sand.u32 1, %s1168_s26   ;;  %p966_p13 = pnand %p964_p12, %p1285_p7 }
  0x43   : > { %s1694_s9 = scalar_select %p1358_p0, 1, 0 }
  0x44   : > { %s264_s3 = scalar_lea.sflag [#allocation3], %s1695_s0  ;;  %p967_p2 = pneg %p966_p13 }
  0x45   : > { %p969_p3 = scmp.lt.u32.totalorder %s1353_s23, %s1656_s1  ;;  %p970_p8 = scmp.lt.u32.totalorder %s968_s28, %s963_s8 }
  0x46   : > { %p972_p9 = scmp.lt.u32.totalorder %s963_s8, %s1353_s23 }
  0x47   : > { %p971_p11 = por %p970_p8, %p969_p3 }
  0x49   : > { %p973_p6 = por %p972_p9, %p971_p11 }
  0x4b   : > { %p974_p4 = pnand %p973_p6, %p967_p2 }
  0x4d   : > { %977 = shalt.err (!%p974_p4)
}
  0x4e   : > { %s978_s0 = scalar_lea.vmem %s276_s14, 512  ;;  %s1175_s30 = smov [#allocation6]  }
  0x4f   : > { %p979_p1 = scmp.ne.s32.totalorder %s276_s14, %s978_s0  ;;  %s983_s26 = sshll.u32 %s1175_s30, 4  ;;  %s984_s26 = int_to_ptr.vmem [resolvable:$false] %s983_s26 }
  0x50   : > { %s985_s17 = scalar_lea.vmem %s984_s26, 1024  ;;  %p986_p10 = scmp.lt.s32.totalorder %s276_s14, %s984_s26 }
  0x51   : > { %p981_p12 = pnand %p979_p1, %p1285_p7  ;;  %p987_p0 = scmp.lt.s32.totalorder %s985_s17, %s978_s0 }
  0x53   : > { %p982_p13 = pneg %p981_p12  ;;  %p988_p5 = por %p987_p0, %p986_p10 }
  0x55   : > { %p989_p3 = pnand %p988_p5, %p982_p13 }
  0x57   : > { %992 = shalt.err (!%p989_p3)
}
  0x58   : > { %p1696_p8 = scmp.ne.s32.totalorder %s1684_s12, 0  ;;  %s1385_s8 = scalar_lea.hbm %s1659_s4, %s1263_s11 }
  0x59   : > { %s993_s18 = scalar_lea.vmem %s1345_s13, 16  ;;  %p1697_p1 = scmp.ne.s32.totalorder %s1694_s9, 0 }
  0x5a   : > { %863 = dma.hbm_to_vmem [thread:$0]  (!%p1696_p8), %s1353_s23, 512, %s276_s14, %s264_s3  }
  0x5b   : > { %p994_p9 = scmp.ne.s32.totalorder %s1345_s13, %s993_s18  ;;  %p995_p4 = pneg %p1697_p1 }
  0x5c   : > { %p1001_p10 = scmp.lt.s32.totalorder %s1345_s13, %s1345_s13  ;;  %p1002_p0 = scmp.lt.s32.totalorder %s993_s18, %s993_s18 }
  0x5d   : > { %p996_p5 = pnand %p995_p4, %p994_p9 }
  0x5e   : > { %p1003_p2 = por %p1002_p0, %p1001_p10 }
  0x5f   : > { %p997_p6 = pneg %p996_p5 }
  0x61   : > { %p1004_p11 = pnand %p1003_p2, %p997_p6 }
  0x63   : > { %1007 = shalt.err (!%p1004_p11)
}
  0x64   : > { %s1176_s26 = smov [#allocation2]   ;;  %s313_s3 = scalar_lea.vmem [#allocation9], %s1260_s10 }
  0x65   : > { %859 = dma.vmem_to_smem (!%p1697_p1), %s1345_s13, 16, %s1176_s26, [#allocation5]  }
  0x66   : > { %s321_s11 = sshll.u32 %s313_s3, 4  ;;  %s1008_s23 = scalar_lea.hbm %s1385_s8, 512  ;;  %s322_s11 = int_to_ptr.vmem [resolvable:$true] %s321_s11 }
  0x67   : > { %p1009_p12 = scmp.ne.s32.totalorder %s1385_s8, %s1008_s23  ;;  %s1013_s9 = scalar_lea.hbm %s1659_s4, 2560 }
  0x68   : > { %p1014_p9 = scmp.lt.u32.totalorder %s1385_s8, %s1659_s4  ;;  %p1015_p4 = scmp.lt.u32.totalorder %s1013_s9, %s1008_s23 }
  0x69   : > { %p1011_p13 = pnand %p1009_p12, %p1285_p7  ;;  %p1017_p6 = scmp.lt.u32.totalorder %s1008_s23, %s1385_s8 }
  0x6a   : > { %p1016_p5 = por %p1015_p4, %p1014_p9 }
  0x6b   : > { %p1012_p3 = pneg %p1011_p13 }
  0x6c   : > { %p1018_p1 = por %p1017_p6, %p1016_p5 }
  0x6e   : > { %p1019_p10 = pnand %p1018_p1, %p1012_p3 }
  0x70   : > { %1022 = shalt.err (!%p1019_p10)
}
  0x71   : > { %s1023_s10 = scalar_lea.vmem %s322_s11, 512  ;;  %s1177_s13 = smov [#allocation9]  }
  0x72   : > { %p1024_p0 = scmp.ne.s32.totalorder %s322_s11, %s1023_s10  ;;  %s1028_s17 = sshll.u32 %s1177_s13, 4  ;;  %s1029_s17 = int_to_ptr.vmem [resolvable:$false] %s1028_s17 }
  0x73   : > { %s1030_s24 = scalar_lea.vmem %s1029_s17, 1024  ;;  %p1031_p12 = scmp.lt.s32.totalorder %s322_s11, %s1029_s17 }
  0x74   : > { %p1026_p2 = pnand %p1024_p0, %p1285_p7  ;;  %p1032_p13 = scmp.lt.s32.totalorder %s1030_s24, %s1023_s10 }
  0x76   : > { %p1027_p11 = pneg %p1026_p2  ;;  %p1033_p8 = por %p1032_p13, %p1031_p12 }
  0x78   : > { %p1034_p4 = pnand %p1033_p8, %p1027_p11 }
  0x7a   : > { %1037 = shalt.err (!%p1034_p4)
}
  0x7b   : > { %p1698_p9 = scmp.ne.s32.totalorder %s1684_s12, 0  ;;  %p1699_p3 = scmp.ne.s32.totalorder %s1693_s15, 0 }
  0x7c   : > { %p1700_p7 = scmp.eq.s32.totalorder (!%p1699_p3), %s1310_s20, 0 }
  0x7d   : > { %869 = dma.hbm_to_vmem [thread:$0]  (!%p1698_p9), %s1385_s8, 512, %s322_s11, %s1279_s19  }
  0x7e   : > { %330 = sbr.rel (%p1699_p3) target bundleno = 241 (0xf1), region = 40 }
  0x85   : > { %1139 = dma.done.wait (%p1700_p7), [#allocation5], 16   ;;  %p1701_p5 = pmov %p1700_p7 }
  0x86   : > { %s1422_s21 = sand.u32 1, %s1164_s25   ;;  %p1702_p8 = scmp.ne.s32.totalorder %s1687_s29, 0 }
  0x87   : > { %1141 = vsyncadd (%p1701_p5), [#allocation5], 4294967280  ;;  %s1425_s28 = sshll.u32 %s1422_s21, 5  ;;  %s337_s12 = scalar_lea.sflag [#allocation3], %s1422_s21 }
  0x88   : > { %s1429_s19 = scalar_lea.vmem [#allocation6], %s1425_s28 }
  0x89   : > { %1143 = dma.done.wait (%p1702_p8), %s337_s12, 512  }
  0x8a   : > { %1145 = vsyncadd (%p1702_p8), %s337_s12, 4294966784  ;;  %s345_s15 = sand.u32 1, %s1310_s20   ;;  %s1439_s18 = scalar_lea.vmem [#allocation7], %s1425_s28 }
  0x8b   : > { %s346_s8 = scalar_lea.sflag [#allocation8], %s345_s15 }
  0x8c   : > { %1147 = dma.done.wait (%p1702_p8), %s346_s8, 1024  }
  0x8d   : > { %1149 = vsyncadd (%p1702_p8), %s346_s8, 4294966272  ;;  %s1446_s26 = scalar_lea.vmem [#allocation9], %s1425_s28 }
  0x8e   : > { %363 = sfence }
  0x8f   : > { %p415_p6 = scmp.lt.s32.totalorder %s1310_s20, 4  ;;  %s420_s3 = sld [smem:[#allocation2]]  ;;  %v431_v0 = vld [vmem:[%s1439_s18] sm:$0xff]  ;;  %v432_v1 = vld [vmem:[%s1439_s18 + $0x8] sm:$0xff]  ;;  %v433_v4 = vld [vmem:[%s1439_s18 + $0x10] sm:$0xff] }
  0x90   : > { %s816_s11 = sld [smem:[#allocation2 + $0x1]]  ;;  %s817_s14 = sld [smem:[#allocation2 + $0x2]]  ;;  %v449_v7 = vld [vmem:[%s1446_s26] sm:$0xff]  ;;  %v450_v14 = vld [vmem:[%s1446_s26 + $0x8] sm:$0xff]  ;;  %v451_v20 = vld [vmem:[%s1446_s26 + $0x10] sm:$0xff] }
  0x91   : > { %s416_s23 = scalar_select %p415_p6, %s1310_s20, 4  ;;  %v434_v24 = vld [vmem:[%s1439_s18 + $0x18] sm:$0xff] }
  0x92   : > { %s818_s22 = sld [smem:[#allocation2 + $0x3]]  ;;  %s407_s10 = scalar_lea.vmem [#allocation11], %s1425_s28  ;;  %v452_v33 = vld [vmem:[%s1446_s26 + $0x18] sm:$0xff] }
  0x93   : > { %s836_s9 = sshll.u32 %s416_s23, 5  ;;  %s1482_s13 = sshll.u32 %s1310_s20, 9 }
  0x94   : > { %s1453_s30 = scalar_lea.vmem %s1657_s2, %s836_s9  ;;  %s581_s17 = sshll.u32 %s407_s10, 4  ;;  %s1504_s17 = int_to_ptr.vmem [resolvable:$true] %s581_s17 }
  0x95   : > { %v427_v2 = vld [vmem:[%s1453_s30] sm:$0xff]  ;;  %v428_v3 = vld [vmem:[%s1453_s30 + $0x8] sm:$0xff]  ;;  %v435_v5 = vstv %s420_s3  ;;  %v429_v15 = vld [vmem:[%s1453_s30 + $0x10] sm:$0xff]  ;;  %s1486_s24 = scalar_lea.vmem [#allocation13], %s1425_s28  ;;  %s1502_s26 = scalar_lea.hbm %s1661_s6, %s1482_s13 }
  0x96   : > { %v440_v6 = vstv %s816_s11  ;;  %v458_v8 = vmul.f32 %v427_v2, %v427_v2  ;;  %v459_v9 = vmul.f32 %v428_v3, %v428_v3  ;;  %v436_v10 = vmul.f32 %v435_v5, %v431_v0  ;;  %v430_v32 = vld [vmem:[%s1453_s30 + $0x18] sm:$0xff]  ;;  %s595_s12 = sshll.u32 %s1486_s24, 4  ;;  %s1506_s3 = sld [smem:[#allocation2 + $0x5]]  ;;  %s1512_s12 = int_to_ptr.vmem [resolvable:$true] %s595_s12 }
  0x97   : > { %v441_v11 = vmul.f32 %v440_v6, %v427_v2  ;;  %v437_v12 = vmul.f32 %v435_v5, %v432_v1  ;;  %v442_v13 = vmul.f32 %v440_v6, %v428_v3  ;;  %v453_v16 = vstv %s817_s14  ;;  %s1508_s11 = sld [smem:[#allocation2 + $0x6]]  ;;  %s1526_s9 = scalar_lea.sflag [#allocation12], %s345_s15 }
  0x98   : > { %v462_v17 = vstv %s818_s22  ;;  %v438_v18 = vmul.f32 %v435_v5, %v433_v4  ;;  %v443_v19 = vmul.f32 %v440_v6, %v429_v15  ;;  %v454_v22 = vmul.f32 %v453_v16, %v449_v7  ;;  %s1520_s22 = scalar_lea.hbm %s1662_s7, %s1482_s13  ;;  %s1038_s0 = scalar_lea.vmem %s1504_s17, 512 }
  0x99   : > { %v1464_v21 = vadd.f32 %v441_v11, %v436_v10  ;;  %v463_v23 = vmul.f32 %v462_v17, %v458_v8  ;;  %v1467_v25 = vadd.f32 %v442_v13, %v437_v12  ;;  %v455_v26 = vmul.f32 %v453_v16, %v450_v14  ;;  %p1039_p1 = scmp.ne.s32.totalorder %s1504_s17, %s1038_s0  ;;  %p1703_p10 = scmp.ne.s32.totalorder %s1689_s16, 0 }
  0x9a   : > { %v464_v27 = vmul.f32 %v462_v17, %v459_v9  ;;  %v1469_v28 = vadd.f32 %v443_v19, %v438_v18  ;;  %v456_v30 = vmul.f32 %v453_v16, %v451_v20  ;;  %v460_v31 = vmul.f32 %v429_v15, %v429_v15  ;;  %s1178_s29 = smov [#allocation11]  }
  0x9b   : > { %v1471_v29 = vadd.f32 %v463_v23, %v454_v22  ;;  %534 = vst [vmem:[%s407_s10] sm:$0xff] %v1464_v21  ;;  %535 = vst [vmem:[%s407_s10 + $0x8] sm:$0xff] %v1467_v25  ;;  %v439_v35 = vmul.f32 %v435_v5, %v434_v24  ;;  %v444_v37 = vmul.f32 %v440_v6, %v430_v32  ;;  %p1040_p0 = pnand %p1039_p1, %p1703_p10  ;;  %s1042_s30 = sshll.u32 %s1178_s29, 4  ;;  %s1043_s30 = int_to_ptr.vmem [resolvable:$false] %s1042_s30 }
  0x9c   : > { %v1477_v34 = vadd.f32 %v464_v27, %v455_v26  ;;  %536 = vst [vmem:[%s407_s10 + $0x10] sm:$0xff] %v1469_v28  ;;  %v465_v36 = vmul.f32 %v462_v17, %v460_v31  ;;  %v457_v38 = vmul.f32 %v453_v16, %v452_v33  ;;  %v461_v39 = vmul.f32 %v430_v32, %v430_v32  ;;  %p1045_p11 = scmp.lt.s32.totalorder %s1504_s17, %s1043_s30 }
  0x9d   : > { %917 = vrsqrt.f32 %v1471_v29  ;;  %538 = vst [vmem:[%s1486_s24] sm:$0xff] %v1471_v29  ;;  %v1496_v41 = vadd.f32 %v444_v37, %v439_v35  ;;  %p1041_p2 = pneg %p1040_p0 }
  0x9e   : > { %919 = vrsqrt.f32 %v1477_v34  ;;  %539 = vst [vmem:[%s1486_s24 + $0x8] sm:$0xff] %v1477_v34  ;;  %v1494_v40 = vadd.f32 %v465_v36, %v456_v30  ;;  %v466_v42 = vmul.f32 %v462_v17, %v461_v39 }
  0x9f   : > { %537 = vst [vmem:[%s407_s10 + $0x18] sm:$0xff] %v1496_v41  ;;  %s1044_s10 = scalar_lea.vmem %s1043_s30, 1024 }
  0xa0   : > { %921 = vrsqrt.f32 %v1494_v40  ;;  %540 = vst [vmem:[%s1486_s24 + $0x10] sm:$0xff] %v1494_v40  ;;  %v1522_v43 = vadd.f32 %v466_v42, %v457_v38  ;;  %p1046_p12 = scmp.lt.s32.totalorder %s1044_s10, %s1038_s0 }
  0xa2   : > { %p1047_p13 = por %p1046_p12, %p1045_p11 }
  0xa4   : > { %p1048_p4 = pnand %p1047_p13, %p1041_p2 }
  0xa6   : > { %1051 = shalt.err (!%p1048_p4)
}
  0xa7   : > { %s1052_s20 = scalar_lea.hbm %s1502_s26, 512  ;;  %s1056_s18 = scalar_lea.hbm %s1661_s6, 2560 }
  0xa8   : > { %p1053_p9 = scmp.ne.s32.totalorder %s1502_s26, %s1052_s20  ;;  %p1057_p5 = scmp.lt.u32.totalorder %s1502_s26, %s1661_s6 }
  0xa9   : > { %p1058_p8 = scmp.lt.u32.totalorder %s1056_s18, %s1052_s20  ;;  %p1060_p1 = scmp.lt.u32.totalorder %s1052_s20, %s1502_s26 }
  0xaa   : > { %p1054_p3 = pnand %p1053_p9, %p1703_p10 }
  0xab   : > { %p1059_p6 = por %p1058_p8, %p1057_p5 }
  0xac   : > { %p1055_p7 = pneg %p1054_p3 }
  0xad   : > { %p1061_p0 = por %p1060_p1, %p1059_p6 }
  0xaf   : > { %p1062_p2 = pnand %p1061_p0, %p1055_p7 }
  0xb1   : > { %1065 = shalt.err (!%p1062_p2)
}
  0xb2   : > { %851 = dma.vmem_to_hbm [thread:$0]  (%p1703_p10), %s1504_s17, 512, %s1502_s26, %s1526_s9   ;;  %923 = vrsqrt.f32 %v1522_v43  ;;  %541 = vst [vmem:[%s1486_s24 + $0x18] sm:$0xff] %v1522_v43 }
  0xb3   : > { %s1066_s0 = scalar_lea.vmem %s1512_s12, 512  ;;  %s1179_s29 = smov [#allocation13]  }
  0xb4   : > { %p1067_p11 = scmp.ne.s32.totalorder %s1512_s12, %s1066_s0  ;;  %s1070_s30 = sshll.u32 %s1179_s29, 4  ;;  %s1071_s30 = int_to_ptr.vmem [resolvable:$false] %s1070_s30 }
  0xb5   : > { %s1072_s10 = scalar_lea.vmem %s1071_s30, 1024  ;;  %p1073_p4 = scmp.lt.s32.totalorder %s1512_s12, %s1071_s30 }
  0xb6   : > { %p1068_p12 = pnand %p1067_p11, %p1703_p10  ;;  %p1074_p9 = scmp.lt.s32.totalorder %s1072_s10, %s1066_s0 }
  0xb8   : > { %p1069_p13 = pneg %p1068_p12  ;;  %p1075_p3 = por %p1074_p9, %p1073_p4 }
  0xba   : > { %p1076_p7 = pnand %p1075_p3, %p1069_p13 }
  0xbc   : > { %1079 = shalt.err (!%p1076_p7)
}
  0xbd   : > { %s1080_s17 = scalar_lea.hbm %s1520_s22, 512  ;;  %s1084_s20 = scalar_lea.hbm %s1662_s7, 2560 }
  0xbe   : > { %p1081_p5 = scmp.ne.s32.totalorder %s1520_s22, %s1080_s17  ;;  %p1085_p1 = scmp.lt.u32.totalorder %s1520_s22, %s1662_s7 }
  0xbf   : > { %p1086_p0 = scmp.lt.u32.totalorder %s1084_s20, %s1080_s17  ;;  %p1088_p11 = scmp.lt.u32.totalorder %s1080_s17, %s1520_s22 }
  0xc0   : > { %p1082_p8 = pnand %p1081_p5, %p1703_p10 }
  0xc1   : > { %p1087_p2 = por %p1086_p0, %p1085_p1 }
  0xc2   : > { %p1083_p6 = pneg %p1082_p8 }
  0xc3   : > { %p1089_p12 = por %p1088_p11, %p1087_p2 }
  0xc5   : > { %p1090_p13 = pnand %p1089_p12, %p1083_p6 }
  0xc7   : > { %1093 = shalt.err (!%p1090_p13)
}
  0xc8   : > { %852 = dma.vmem_to_hbm [thread:$0]  (%p1703_p10), %s1512_s12, 512, %s1520_s22, %s1526_s9   ;;  %v918_v44 = vpop.eup %917  ;;  %vm473_vm0 = vcmp.eq.f32.partialorder %v1471_v29, inf  ;;  %v476_v45 = vand.u32 2147483648, %v1471_v29  ;;  %vm475_vm1 = vcmp.eq.f32.partialorder %v1471_v29, 0.0  ;;  %vm480_vm2 = vcmp.eq.f32.partialorder %v1477_v34, inf  ;;  %v509_v14 = vld [vmem:[%s1429_s19] sm:$0xff] }
  0xc9   : > { %v920_v46 = vpop.eup %919  ;;  %v472_v47 = vmul.f32 %v918_v44, %v1471_v29  ;;  %v483_v48 = vand.u32 2147483648, %v1477_v34  ;;  %v499_v49 = vstv %s1506_s3  ;;  %vm482_vm3 = vcmp.eq.f32.partialorder %v1477_v34, 0.0  ;;  %s819_s12 = sld [smem:[#allocation2 + $0x4]]  ;;  %v510_v18 = vld [vmem:[%s1429_s19 + $0x8] sm:$0xff]  ;;  %s400_s3 = scalar_lea.vmem [#allocation10], %s1425_s28 }
  0xca   : > { %v479_v50 = vmul.f32 %v920_v46, %v1477_v34  ;;  %v504_v52 = vstv %s1508_s11  ;;  %v922_v53 = vpop.eup %921  ;;  %vm487_vm4 = vcmp.eq.f32.partialorder %v1494_v40, inf  ;;  %v490_v56 = vand.u32 2147483648, %v1494_v40  ;;  %s567_s11 = sshll.u32 %s400_s3, 4  ;;  %s1610_s18 = scalar_lea.hbm %s1660_s5, %s1482_s13  ;;  %s1612_s11 = int_to_ptr.vmem [resolvable:$true] %s567_s11 }
  0xcb   : > { %v474_v51 = vsel %vm473_vm0, %v1471_v29, %v472_v47  ;;  %v486_v59 = vmul.f32 %v922_v53, %v1494_v40  ;;  %vm489_vm5 = vcmp.eq.f32.partialorder %v1494_v40, 0.0  ;;  %v924_v61 = vpop.eup %923  ;;  %vm494_vm6 = vcmp.eq.f32.partialorder %v1522_v43, inf  ;;  %v512_v29 = vld [vmem:[%s1429_s19 + $0x18] sm:$0xff]  ;;  %s543_s28 = scalar_lea.sflag [#allocation4], %s1422_s21  ;;  %s1094_s23 = scalar_lea.vmem %s1612_s11, 512 }
  0xcc   : > { %v477_v54 = vsel %vm475_vm1, %v476_v45, %v474_v51  ;;  %v481_v55 = vsel %vm480_vm2, %v1477_v34, %v479_v50  ;;  %v497_v0 = vand.u32 2147483648, %v1522_v43  ;;  %v493_v3 = vmul.f32 %v924_v61, %v1522_v43  ;;  %p1095_p4 = scmp.ne.s32.totalorder %s1612_s11, %s1094_s23 }
  0xcd   : > { %v500_v57 = vmul.f32 %v499_v49, %v477_v54  ;;  %v484_v58 = vsel %vm482_vm3, %v483_v48, %v481_v55  ;;  %v488_v63 = vsel %vm487_vm4, %v1494_v40, %v486_v59  ;;  %vm496_vm7 = vcmp.eq.f32.partialorder %v1522_v43, 0.0 }
  0xce   : > { %v501_v60 = vmul.f32 %v499_v49, %v484_v58  ;;  %v491_v2 = vsel %vm489_vm5, %v490_v56, %v488_v63  ;;  %v495_v5 = vsel %vm494_vm6, %v1522_v43, %v493_v3  ;;  %p1096_p9 = pnand %p1095_p4, %p1703_p10 }
  0xcf   : > { %v505_v62 = vadd.f32 %v504_v52, %v500_v57  ;;  %v502_v4 = vmul.f32 %v499_v49, %v491_v2  ;;  %v498_v7 = vsel %vm496_vm7, %v497_v0, %v495_v5  ;;  %v513_v9 = vstv %s819_s12 }
  0xd0   : > { %v506_v1 = vadd.f32 %v504_v52, %v501_v60  ;;  %v503_v8 = vmul.f32 %v499_v49, %v498_v7  ;;  %v514_v11 = vmul.f32 %v513_v9, %v1464_v21  ;;  %v515_v12 = vmul.f32 %v513_v9, %v1467_v25  ;;  %v511_v21 = vld [vmem:[%s1429_s19 + $0x10] sm:$0xff]  ;;  %p1097_p3 = pneg %p1096_p9  ;;  %s1180_s19 = smov [#allocation10]  }
  0xd1   : > { %925 = vrcp.f32 %v505_v62  ;;  %v507_v6 = vadd.f32 %v504_v52, %v502_v4  ;;  %v516_v16 = vmul.f32 %v513_v9, %v1469_v28  ;;  %v517_v23 = vmul.f32 %v513_v9, %v1496_v41  ;;  %s1098_s14 = sshll.u32 %s1180_s19, 4  ;;  %s1099_s14 = int_to_ptr.vmem [resolvable:$false] %s1098_s14 }
  0xd2   : > { %927 = vrcp.f32 %v506_v1  ;;  %v508_v10 = vadd.f32 %v504_v52, %v503_v8  ;;  %s1100_s0 = scalar_lea.vmem %s1099_s14, 1024  ;;  %p1101_p7 = scmp.lt.s32.totalorder %s1612_s11, %s1099_s14 }
  0xd3   : > { %929 = vrcp.f32 %v507_v6  ;;  %p1102_p5 = scmp.lt.s32.totalorder %s1100_s0, %s1094_s23 }
  0xd4   : > { %931 = vrcp.f32 %v508_v10 }
  0xd5   : > { %p1103_p8 = por %p1102_p5, %p1101_p7 }
  0xd7   : > { %p1104_p6 = pnand %p1103_p8, %p1097_p3 }
  0xdb   : > { %v926_v13 = vpop.eup %925 }
  0xdc   : > { %v928_v15 = vpop.eup %927  ;;  %v522_v17 = vmul.f32 %v926_v13, %v514_v11 }
  0xdd   : > { %v523_v19 = vmul.f32 %v928_v15, %v515_v12  ;;  %v930_v22 = vpop.eup %929 }
  0xde   : > { %v526_v20 = vsub.f32 %v509_v14, %v522_v17  ;;  %v524_v25 = vmul.f32 %v930_v22, %v516_v16  ;;  %v932_v26 = vpop.eup %931 }
  0xdf   : > { %v527_v24 = vsub.f32 %v510_v18, %v523_v19  ;;  %v525_v28 = vmul.f32 %v932_v26, %v517_v23 }
  0xe0   : > { %530 = vst [vmem:[%s400_s3] sm:$0xff] %v526_v20  ;;  %v528_v27 = vsub.f32 %v511_v21, %v524_v25 }
  0xe1   : > { %531 = vst [vmem:[%s400_s3 + $0x8] sm:$0xff] %v527_v24  ;;  %v529_v30 = vsub.f32 %v512_v29, %v525_v28 }
  0xe2   : > { %532 = vst [vmem:[%s400_s3 + $0x10] sm:$0xff] %v528_v27 }
  0xe3   : > { %533 = vst [vmem:[%s400_s3 + $0x18] sm:$0xff] %v529_v30 }
  0xe4   : > { %1107 = shalt.err (!%p1104_p6)
}
  0xe5   : > { %s1108_s21 = scalar_lea.hbm %s1610_s18, 512  ;;  %s1112_s30 = scalar_lea.hbm %s1660_s5, 2560 }
  0xe6   : > { %p1109_p1 = scmp.ne.s32.totalorder %s1610_s18, %s1108_s21  ;;  %p1113_p11 = scmp.lt.u32.totalorder %s1610_s18, %s1660_s5 }
  0xe7   : > { %p1114_p12 = scmp.lt.u32.totalorder %s1112_s30, %s1108_s21  ;;  %p1116_p4 = scmp.lt.u32.totalorder %s1108_s21, %s1610_s18 }
  0xe8   : > { %p1110_p0 = pnand %p1109_p1, %p1703_p10 }
  0xe9   : > { %p1115_p13 = por %p1114_p12, %p1113_p11 }
  0xea   : > { %p1111_p2 = pneg %p1110_p0 }
  0xeb   : > { %p1117_p9 = por %p1116_p4, %p1115_p13 }
  0xed   : > { %p1118_p3 = pnand %p1117_p9, %p1111_p2 }
  0xef   : > { %1121 = shalt.err (!%p1118_p3)
}
  0xf0   : > { %850 = dma.vmem_to_hbm [thread:$0]  (%p1703_p10), %s1612_s11, 512, %s1610_s18, %s543_s28  }
  0xf1 PF: > { %s1704_s24 = sld [smem:[#allocation19_spill]]  ;;  %s1705_s26 = sld [smem:[#allocation23_spill]] }
  0xf2   : > { %p883_p7 = scmp.ge.s32.totalorder %s1172_s27, 2 }
  0xf7   : > { %s607_s20 = sand.u32 1, %s1704_s24   ;;  %p1706_p5 = scmp.ne.s32.totalorder %s1705_s26, 0 }
  0xf8   : > { %s608_s15 = scalar_lea.sflag [#allocation4], %s607_s20 }
  0xf9   : > { %p871_p8 = pnand %p883_p7, %p1706_p5 }
  0xfb   : > { %1151 = dma.done.wait (!%p871_p8), %s608_s15, 512  }
  0xfc   : > { %1153 = vsyncadd (!%p871_p8), %s608_s15, 4294966784  ;;  %s1707_s8 = sadd.s32 4294967294, %s1172_s27  }
  0xfd   : > { %s616_s12 = sand.u32 1, %s1707_s8  }
  0xfe   : > { %s617_s3 = scalar_lea.sflag [#allocation12], %s616_s12 }
  0xff   : > { %1155 = dma.done.wait (!%p871_p8), %s617_s3, 1024  }
 0x100   : > { %1157 = vsyncadd (!%p871_p8), %s617_s3, 4294966272  ;;  %s1708_s27 = sld [smem:[#allocation21_spill]]  ;;  %s1709_s16 = sld [smem:[#allocation20_spill]] }
 0x101   : > { %s1710_s26 = sld [smem:[#allocation22_spill]]  ;;  %s1711_s24 = smov %s1164_s25 }
 0x106   : > { %p28_p10 = scmp.ge.s32.totalorder %s1708_s27, 7   ;;  %s1712_s25 = smov %s1709_s16 }
 0x108   :  { %30 = sbr.rel (!%p28_p10) target bundleno = 13 (0xd), region = 149 }
 0x10f   :  { %631 = vsyncpa [#allocation3], 1 }
 0x110   :  { %633 = vsyncpa [#allocation3 + $0x1], 1 }
 0x111   :  { %634 = vsyncpa [#allocation8], 1 }
 0x112   :  { %636 = vsyncpa [#allocation8 + $0x1], 1 }
 0x113   :  { %637 = vsyncpa [#allocation4], 1 }
 0x114   :  { %639 = vsyncpa [#allocation4 + $0x1], 1 }
 0x115   :  { %640 = vsyncpa [#allocation12], 1 }
 0x116   :  { %642 = vsyncpa [#allocation12 + $0x1], 1 }
 0x117   :  { %643 = vsyncpa [#allocation5], 1 }
 0x118   :  { %645 = vsyncpa [#allocation5 + $0x1], 1 }

</bundles_post_ra>
